<compile_context>
chip_gen: v7x
topology: tpu7x:2x2x1
jax: 0.10.0
libtpu: 0.0.40
codegen_flags: <defaults>
</compile_context>

<pallas_src>
import jax
import jax.numpy as jnp
from jax.experimental import pallas as pl
from jax.experimental.pallas import tpu as pltpu

_LANES = 128
_TARGET_BLOCK_BYTES = 4 * 1024 * 1024     # ~4 MiB per block
_MAX_BLOCK_BYTES = 8 * 1024 * 1024        # v7x-safe ceiling (2x(in+out) <= 32 MiB)
_MIN_SPLIT_BYTES = 1 * 1024 * 1024        # only megacore-split when each half >= ~1 MiB
_WHOLE_BLOCK_MAX_BYTES = 2 * 1024 * 1024  # unaligned shapes up to this: one full-array block
_VMEM_LIMIT_BYTES = 32 * 1024 * 1024      # raises v5e's 16 MiB default; <= default on v6e/v7x


def _mish_kernel(x_ref, o_ref):
    xf = x_ref[...].astype(jnp.float32)
    # mish(x) = x * tanh(softplus(x)).  With t = exp(min(x, 20)):
    #   tanh(log1p(t)) = t*(t+2) / (t*(t+2) + 2)        (exact algebra)
    # The clamp at 20 matches torch's Softplus threshold; the ratio rounds to
    # 1.0 there, giving the same linear passthrough.
    t = jnp.exp(jnp.minimum(xf, 20.0))
    u = t * (t + 2.0)
    if jnp.dtype(o_ref.dtype) == jnp.dtype(jnp.float32):
        y = xf * (u / (u + 2.0))  # exact divide: holds the 1e-5 f32 tolerance
    else:
        # u/(u+2) = 1 - 2/(u+2); approx reciprocal runs on the EUP slot and its
        # ~1e-4 relative error is far below bf16/f16 resolution.
        y = xf - (2.0 * xf) * pl.reciprocal(u + 2.0, approx=True)
    o_ref[...] = y.astype(o_ref.dtype)


def _sublane_multiple(dtype) -> int:
    # Sub-32-bit dtypes pack along sublanes: f32 -> 8, bf16/f16 -> 16, int8 -> 32.
    itemsize = jnp.dtype(dtype).itemsize
    return 8 * max(1, 4 // itemsize)


def _round_up(x: int, m: int) -> int:
    return ((x + m - 1) // m) * m


def _mish_whole_array(x: jax.Array) -> jax.Array:
    """Single full-array VMEM block: no grid, no padding, no output slice."""
    x2d = x if x.ndim >= 2 else x.reshape(1, -1)
    out = pl.pallas_call(
        _mish_kernel,
        out_shape=jax.ShapeDtypeStruct(x2d.shape, x.dtype),
    )(x2d)
    return out.reshape(x.shape)


def _mish_tiled_2d(x2d: jax.Array) -> jax.Array:
    """Streamed (rows, 128) path with large dtype-aware blocks."""
    rows = x2d.shape[0]
    itemsize = jnp.dtype(x2d.dtype).itemsize
    sub = _sublane_multiple(x2d.dtype)
    row_bytes = _LANES * itemsize

    # ~4 MiB blocks regardless of dtype (8192 rows f32, 16384 rows bf16).
    target_rows = max(sub, (_TARGET_BLOCK_BYTES // row_bytes) // sub * sub)
    tr = min(target_rows, _round_up(rows, sub))
    num_steps = pl.cdiv(rows, tr)

    # Megacore split: only when each half is >= ~1 MiB, and prefer an even
    # number of equal-size steps so both v7x TensorCores stay balanced.
    min_split_rows = max(sub, pl.cdiv(_MIN_SPLIT_BYTES, row_bytes))
    if rows >= 2 * min_split_rows:
        if num_steps == 1:
            num_steps = 2
        elif num_steps % 2 == 1:
            num_steps += 1
    if num_steps > 1:
        tr = _round_up(pl.cdiv(rows, num_steps), sub)
        num_steps = pl.cdiv(rows, tr)

    assert tr * row_bytes <= _MAX_BLOCK_BYTES

    return pl.pallas_call(
        _mish_kernel,
        out_shape=jax.ShapeDtypeStruct((rows, _LANES), x2d.dtype),
        grid_spec=pltpu.PrefetchScalarGridSpec(
            num_scalar_prefetch=0,
            grid=(num_steps,),
            in_specs=[pl.BlockSpec((tr, _LANES), lambda i: (i, 0))],
            out_specs=pl.BlockSpec((tr, _LANES), lambda i: (i, 0)),
        ),
        compiler_params=pltpu.CompilerParams(
            dimension_semantics=("parallel",),
            vmem_limit_bytes=_VMEM_LIMIT_BYTES,
        ),
    )(x2d)


def mish(x: jax.Array) -> jax.Array:
    """Elementwise Mish. Accepts any shape / float dtype."""
    orig_shape = x.shape
    n = x.size
    if n == 0:
        return x
    itemsize = jnp.dtype(x.dtype).itemsize

    if n % _LANES == 0:
        # Zero-copy lane-dense view; a ragged last block is clipped by Pallas,
        # so no pad and no output slice are needed.
        rows = n // _LANES
        out2d = _mish_tiled_2d(x.reshape(rows, _LANES))
        return out2d.reshape(orig_shape)

    if n * itemsize <= _WHOLE_BLOCK_MAX_BYTES:
        # Small, non-128-multiple shapes: process the original array as one
        # full-array VMEM block (no pad, no slice).
        return _mish_whole_array(x)

    # Rare: large AND not a multiple of 128 elements. Pad the flat view up to a
    # lane multiple and slice back (one extra HBM round trip each way).
    rows = pl.cdiv(n, _LANES)
    pad = rows * _LANES - n
    flat = jnp.concatenate([x.reshape(-1), jnp.zeros((pad,), dtype=x.dtype)])
    out2d = _mish_tiled_2d(flat.reshape(rows, _LANES))
    return out2d.reshape(-1)[:n].reshape(orig_shape)


def mish_ref(x):
    # Matches torch: softplus with beta=1, threshold=20, then x * tanh(sp).
    xf = x.astype(jnp.float32)
    sp = jnp.where(xf > 20.0, xf, jnp.log1p(jnp.exp(jnp.minimum(xf, 20.0))))
    return (xf * jnp.tanh(sp)).astype(x.dtype)


if __name__ == "__main__":
    key = jax.random.PRNGKey(0)
    k1, k2, k3 = jax.random.split(key, 3)

    # NCHW conv activation like the head-pose net: aligned, single-block grid.
    x = jax.random.normal(k1, (2, 4, 16, 16), dtype=jnp.float32) * 3.0
    y = jax.block_until_ready(mish(x))
    assert y.shape == x.shape and y.dtype == x.dtype
    assert jnp.allclose(y, mish_ref(x), atol=1e-5, rtol=1e-5)

    # Ragged bf16 shape: whole-array single block (no pad / no slice), approx-recip path.
    xb = (jax.random.normal(k2, (3, 5, 7)) * 3.0).astype(jnp.bfloat16)
    yb = jax.block_until_ready(mish(xb))
    assert yb.shape == xb.shape and yb.dtype == xb.dtype
    assert jnp.allclose(yb.astype(jnp.float32), mish_ref(xb).astype(jnp.float32),
                        atol=2e-2, rtol=2e-2)

    # Larger aligned f32 tensor: exercises the multi-step, megacore-split grid.
    xl = jax.random.normal(k3, (8, 16, 64, 64), dtype=jnp.float32) * 3.0
    yl = jax.block_until_ready(mish(xl))
    assert yl.shape == xl.shape and yl.dtype == xl.dtype
    assert jnp.allclose(yl, mish_ref(xl), atol=1e-5, rtol=1e-5)

    print("KERNEL_OK")
</pallas_src>

<mosaic_0001>
module attributes {stable_mosaic.version = 11 : i64} {
  func.func @_mish_kernel(%arg0: i32, %arg1: memref<16x128xf32, #tpu.memory_space<vmem>>, %arg2: memref<16x128xf32, #tpu.memory_space<vmem>>) attributes {dimension_semantics = [#tpu.dimension_semantics<parallel>], iteration_bounds = array<i64: 1>, scalar_prefetch = 0 : i64, scratch_operands = 0 : i64, tpu.core_type = #tpu.core_type<tc>, window_params = [{transform_indices = @transform_0, window_bounds = array<i64: 16, 128>}, {transform_indices = @transform_1, window_bounds = array<i64: 16, 128>}]} {
    %c0 = arith.constant 0 : index
    %c0_0 = arith.constant 0 : index
    %0 = vector.load %arg1[%c0, %c0_0] : memref<16x128xf32, #tpu.memory_space<vmem>>, vector<16x128xf32>
    %cst = arith.constant 2.000000e+01 : f32
    %1 = vector.broadcast %cst : f32 to vector<16x128xf32>
    %2 = arith.minimumf %0, %1 : vector<16x128xf32>
    %3 = math.exp %2 : vector<16x128xf32>
    %cst_1 = arith.constant 2.000000e+00 : f32
    %4 = vector.broadcast %cst_1 : f32 to vector<16x128xf32>
    %5 = arith.addf %3, %4 : vector<16x128xf32>
    %6 = arith.mulf %3, %5 : vector<16x128xf32>
    %cst_2 = arith.constant 2.000000e+00 : f32
    %7 = vector.broadcast %cst_2 : f32 to vector<16x128xf32>
    %8 = arith.addf %6, %7 : vector<16x128xf32>
    %9 = arith.divf %6, %8 : vector<16x128xf32>
    %10 = arith.mulf %0, %9 : vector<16x128xf32>
    %c0_3 = arith.constant 0 : index
    %c0_4 = arith.constant 0 : index
    %11 = vector.load %arg2[%c0_3, %c0_4] : memref<16x128xf32, #tpu.memory_space<vmem>>, vector<16x128xf32>
    tpu.vector_store %arg2[%c0_3, %c0_4], %10 {strides = array<i32>} : memref<16x128xf32, #tpu.memory_space<vmem>>, vector<16x128xf32>,
    return
  }
  func.func @transform_0(%arg0: i32) -> (i32, i32) {
    %c0_i32 = arith.constant 0 : i32
    %c0_i32_0 = arith.constant 0 : i32
    return %arg0, %c0_i32 : i32, i32
  }
  func.func @transform_1(%arg0: i32) -> (i32, i32) {
    %c0_i32 = arith.constant 0 : i32
    %c0_i32_0 = arith.constant 0 : i32
    return %arg0, %c0_i32 : i32, i32
  }
}

</mosaic_0001>

<bundles_post_ra>
// kernel: tpu_custom_call.1
= control target key start
LH: loop header
LB: loop body
LE: loop exit
PB: predicated region body
PF: predicated region fallthrough
CT: control target
= control target key end

     0   :  { %6 = vsyncpa [#allocation3], 0  ;;  %s166_s0 = inlined_call_operand.hbm [shape: f32[16,128], index: 0, kind: input, shape index: {}]   ;;  %s167_s1 = inlined_call_operand.hbm [shape: f32[16,128], index: 1, kind: output, shape index: {}]  }
   0x1   :  { %7 = vsyncpa [#allocation4], 0  ;;  %s122_s6 = smov [#allocation2]   ;;  %s74_s10 = scalar_lea.hbm %s166_s0, 256 }
   0x2   :  { %s13_s7 = sshll.u32 %s122_s6, 4  ;;  %p75_p0 = scmp.ne.s32.totalorder %s166_s0, %s74_s10  ;;  %s14_s7 = int_to_ptr.vmem [resolvable:$true] %s13_s7 }
   0x3   :  { %p78_p1 = scmp.lt.u32.totalorder %s74_s10, %s166_s0 }
   0x5   :  { %p80_p2 = pnand %p78_p1, %p75_p0 }
   0x7   :  { %83 = shalt.err (!%p80_p2)
}
   0x8   :  { %s84_s15 = scalar_lea.vmem %s14_s7, 256  ;;  %p89_p4 = scmp.lt.s32.totalorder %s14_s7, %s14_s7 }
   0x9   :  { %p85_p3 = scmp.ne.s32.totalorder %s14_s7, %s84_s15  ;;  %p90_p5 = scmp.lt.s32.totalorder %s84_s15, %s84_s15 }
   0xb   :  { %p91_p6 = por %p90_p5, %p89_p4 }
   0xd   :  { %p92_p7 = pnand %p91_p6, %p85_p3 }
   0xf   :  { %95 = shalt.err (!%p92_p7)
}
  0x10   :  { %s123_s16 = smov 128   ;;  %s124_s17 = smov 8  }
  0x11   :  { %19 = dma.hbm_to_vmem [thread:$0]  %s166_s0, 256, %s14_s7, [#allocation3], %s123_s16, %s123_s16, %s124_s17  }
  0x12   :  { %118 = dma.done.wait [#allocation3], 256  }
  0x13   :  { %119 = vsyncadd [#allocation3], 4294967040  ;;  %v23_v0 = vld [vmem:[#allocation2] sm:$0xff]  ;;  %v24_v1 = vld [vmem:[#allocation2 + $0x8] sm:$0xff]  ;;  %s125_s0 = smov [#allocation5]  }
  0x14   :  { %v25_v2 = vmin.f32 %v23_v0, 20.0  ;;  %v26_v3 = vmin.f32 %v24_v1, 20.0  ;;  %s50_s20 = sshll.u32 %s125_s0, 4  ;;  %s51_s20 = int_to_ptr.vmem [resolvable:$true] %s50_s20 }
  0x15   :  { %s96_s21 = scalar_lea.vmem %s51_s20, 256  ;;  %p101_p9 = scmp.lt.s32.totalorder %s51_s20, %s51_s20 }
  0x16   :  { %v27_v4 = vmul.f32 1.442695, %v25_v2  ;;  %v29_v5 = vmul.f32 1.442695, %v26_v3  ;;  %p97_p8 = scmp.ne.s32.totalorder %s51_s20, %s96_s21  ;;  %p102_p10 = scmp.lt.s32.totalorder %s96_s21, %s96_s21 }
  0x18   :  { %66 = vpow2.f32 %v27_v4  ;;  %p103_p11 = por %p102_p10, %p101_p9 }
  0x19   :  { %68 = vpow2.f32 %v29_v5 }
  0x1a   :  { %p104_p12 = pnand %p103_p11, %p97_p8 }
  0x22   :  { %v67_v6 = vpop.eup %66 }
  0x23   :  { %v69_v7 = vpop.eup %68  ;;  %v31_v8 = vadd.f32 2.0, %v67_v6 }
  0x24   :  { %v32_v9 = vadd.f32 2.0, %v69_v7 }
  0x25   :  { %v33_v10 = vmul.f32 %v67_v6, %v31_v8 }
  0x26   :  { %v34_v11 = vmul.f32 %v69_v7, %v32_v9 }
  0x27   :  { %v35_v12 = vadd.f32 2.0, %v33_v10 }
  0x28   :  { %v36_v13 = vadd.f32 2.0, %v34_v11 }
  0x29   :  { %70 = vrcp.f32 %v35_v12 }
  0x2a   :  { %72 = vrcp.f32 %v36_v13 }
  0x33   :  { %v71_v14 = vpop.eup %70 }
  0x34   :  { %v73_v15 = vpop.eup %72  ;;  %v38_v16 = vmul.f32 %v71_v14, %v33_v10 }
  0x35   :  { %v40_v17 = vmul.f32 %v73_v15, %v34_v11 }
  0x36   :  { %v41_v18 = vmul.f32 %v38_v16, %v23_v0 }
  0x37   :  { %v42_v19 = vmul.f32 %v40_v17, %v24_v1 }
  0x38   :  { %43 = vst [vmem:[#allocation5] sm:$0xff] %v41_v18 }
  0x39   :  { %44 = vst [vmem:[#allocation5 + $0x8] sm:$0xff] %v42_v19 }
  0x3a   :  { %107 = shalt.err (!%p104_p12)
}
  0x3b   :  { %s108_s24 = scalar_lea.hbm %s167_s1, 256 }
  0x3c   :  { %p109_p13 = scmp.ne.s32.totalorder %s167_s1, %s108_s24  ;;  %p112_p0 = scmp.lt.u32.totalorder %s108_s24, %s167_s1 }
  0x3e   :  { %p114_p1 = pnand %p112_p0, %p109_p13 }
  0x40   :  { %117 = shalt.err (!%p114_p1)
}
  0x41   :  { %56 = dma.vmem_to_hbm [thread:$0]  %s51_s20, 256, %s167_s1, [#allocation4], %s123_s16, %s123_s16, %s124_s17  }
  0x42   :  { %120 = dma.done.wait [#allocation4], 256  }
  0x43   :  { %121 = vsyncadd [#allocation4], 4294967040 }
  0x44   :  { %60 = vsyncpa [#allocation3], 1 }
  0x45   :  { %61 = vsyncpa [#allocation4], 1 }

</bundles_post_ra>
